<compile_context>
chip_gen: v6e
topology: v6e:2x2x1
jax: 0.10.0
libtpu: 0.0.40
codegen_flags: <defaults>
</compile_context>

<pallas_src>
import jax
import jax.numpy as jnp
from jax.experimental import pallas as pl
from jax.experimental.pallas import tpu as pltpu


def _round_up(x, m):
    return ((x + m - 1) // m) * m


def deconv_stats_kernel(x_ref, w_ref, sum_ref, ssq_ref):
    # xW for this row tile; per packed-channel partial sum / sum-of-squares.
    xw = jnp.dot(x_ref[...], w_ref[...], preferred_element_type=jnp.float32)
    sum_ref[...] = jnp.sum(xw, axis=0)[None, None, :]
    ssq_ref[...] = jnp.sum(xw * xw, axis=0)[None, None, :]


def deconv_bn_relu_kernel(x_ref, w_ref, a_ref, c_ref, o_ref):
    # Recompute xW (cheap: contraction dim = Cin) and apply fused BN affine + ReLU.
    xw = jnp.dot(x_ref[...], w_ref[...], preferred_element_type=jnp.float32)
    o_ref[...] = jnp.maximum(xw * a_ref[...] + c_ref[...], 0.0)


def deconv_layer_forward(x, weight, bias, gamma, beta, eps=1e-5):
    N, Cin, D, H, W = x.shape
    Cout = weight.shape[1]
    M = N * D * H * W

    # ---- lane-dense packed channel width: K8 = 8*Coutp is a multiple of 128 ----
    Coutp = _round_up(Cout, 16)
    K8 = 8 * Coutp

    # ---- row tile: as large as a conservative VMEM budget allows (<= 512) ----
    # ~ double-buffered output block + in-kernel matmul temporary + x blocks.
    vmem_budget = 20 * 1024 * 1024
    per_row_bytes = 4 * (3 * K8 + 2 * Cin)
    tm = min(512, max(8, (vmem_budget // per_row_bytes) // 8 * 8), _round_up(M, 8))
    Mp = _round_up(M, tm)
    nt = Mp // tm

    # ---- glue: pack operands into the matmul layout ----
    x2d = jnp.transpose(x, (0, 2, 3, 4, 1)).reshape(M, Cin)
    if Mp != M:
        x2d = jnp.pad(x2d, ((0, Mp - M), (0, 0)))          # zero rows: contribute 0 to stats
    # PyTorch ConvTranspose3d weight (Cin, Cout, 2, 2, 2) -> (Cin, 8, Coutp) -> (Cin, K8)
    w_p = jnp.transpose(weight.reshape(Cin, Cout, 8), (0, 2, 1))
    w_p = jnp.pad(w_p, ((0, 0), (0, 0), (0, Coutp - Cout))).reshape(Cin, K8)

    grid = (nt,)
    cparams = pltpu.CompilerParams(
        dimension_semantics=("parallel",),                  # megacore-shardable on v7x
        vmem_limit_bytes=32 * 1024 * 1024,
    )

    # ---- kernel 1: per-tile partial sum / sum-of-squares of xW (no bias) ----
    psum, pssq = pl.pallas_call(
        deconv_stats_kernel,
        out_shape=(
            jax.ShapeDtypeStruct((nt, 1, K8), jnp.float32),
            jax.ShapeDtypeStruct((nt, 1, K8), jnp.float32),
        ),
        grid=grid,
        in_specs=[
            pl.BlockSpec((tm, Cin), lambda i: (i, 0)),
            pl.BlockSpec((Cin, K8), lambda i: (0, 0)),
        ],
        out_specs=(
            pl.BlockSpec((1, 1, K8), lambda i: (i, 0, 0)),
            pl.BlockSpec((1, 1, K8), lambda i: (i, 0, 0)),
        ),
        compiler_params=cparams,
    )(x2d, w_p)

    # ---- tiny scalar glue: BatchNorm batch stats + fused affine coefficients ----
    # y = xW + bias; train-mode BN of y: mean_y = mu_xw + bias, var_y = var_xw,
    # so the conv bias cancels analytically:
    #   out = a * xW + c,   a = gamma / sqrt(var_xw + eps),   c = beta - a * mu_xw
    count = jnp.float32(M * 8)                               # N * (2D) * (2H) * (2W)
    ch_sum = psum.reshape(nt, 8, Coutp).sum(axis=(0, 1))[:Cout]
    ch_ssq = pssq.reshape(nt, 8, Coutp).sum(axis=(0, 1))[:Cout]
    mu_xw = ch_sum / count
    var = ch_ssq / count - mu_xw * mu_xw                     # biased variance, as BN uses
    # TODO(synk): E[x^2]-E[x]^2 can cancel badly for very large M / large means; switch to
    # a centered two-pass accumulation if tolerances ever tighten.
    a = gamma * jax.lax.rsqrt(var + eps)
    c = beta - a * mu_xw
    a_p = jnp.tile(jnp.pad(a, (0, Coutp - Cout)), 8).reshape(1, K8)
    c_p = jnp.tile(jnp.pad(c, (0, Coutp - Cout)), 8).reshape(1, K8)

    # ---- kernel 2: recompute xW, fused BN affine + ReLU, write final packed output ----
    out2d = pl.pallas_call(
        deconv_bn_relu_kernel,
        out_shape=jax.ShapeDtypeStruct((Mp, K8), jnp.float32),
        grid=grid,
        in_specs=[
            pl.BlockSpec((tm, Cin), lambda i: (i, 0)),
            pl.BlockSpec((Cin, K8), lambda i: (0, 0)),
            pl.BlockSpec((1, K8), lambda i: (0, 0)),
            pl.BlockSpec((1, K8), lambda i: (0, 0)),
        ],
        out_specs=pl.BlockSpec((tm, K8), lambda i: (i, 0)),
        compiler_params=cparams,
    )(x2d, w_p, a_p, c_p)

    # ---- glue: scatter back to the PyTorch NCDHW output layout ----
    # TODO(synk): this 8-D transpose is one extra HBM pass done by XLA; emit channels-last
    # (NDHWC) here instead if the downstream consumer tolerates it.
    out = out2d[:M].reshape(N, D, H, W, 8, Coutp)[..., :Cout]
    out = out.reshape(N, D, H, W, 2, 2, 2, Cout)
    out = jnp.transpose(out, (0, 7, 1, 4, 2, 5, 3, 6)).reshape(N, Cout, 2 * D, 2 * H, 2 * W)
    return out


def reference_forward(x, weight, bias, gamma, beta, eps=1e-5):
    """Pure-JAX reference matching PyTorch semantics (train-mode BatchNorm)."""
    N, Cin, D, H, W = x.shape
    Cout = weight.shape[1]
    y = jnp.einsum("nidhw,ioabc->ndhwabco", x, weight) + bias
    y = jnp.transpose(y, (0, 7, 1, 4, 2, 5, 3, 6)).reshape(N, Cout, 2 * D, 2 * H, 2 * W)
    mean = y.mean(axis=(0, 2, 3, 4), keepdims=True)
    var = y.var(axis=(0, 2, 3, 4), keepdims=True)            # biased
    yhat = (y - mean) * jax.lax.rsqrt(var + eps)
    yhat = yhat * gamma.reshape(1, Cout, 1, 1, 1) + beta.reshape(1, Cout, 1, 1, 1)
    return jnp.maximum(yhat, 0.0)


if __name__ == "__main__":
    N, Cin, Cout, D, H, W = 2, 4, 4, 4, 4, 4
    key = jax.random.PRNGKey(0)
    k1, k2, k3 = jax.random.split(key, 3)

    x = jax.random.normal(k1, (N, Cin, D, H, W), jnp.float32)
    # shapes match nn.ConvTranspose3d(Cin, Cout, kernel_size=2, stride=2) + BatchNorm3d(Cout)
    weight = 0.1 * jax.random.normal(k2, (Cin, Cout, 2, 2, 2), jnp.float32)
    bias = 0.1 * jax.random.normal(k3, (Cout,), jnp.float32)
    gamma = jnp.ones((Cout,), jnp.float32)
    beta = jnp.zeros((Cout,), jnp.float32)

    out = deconv_layer_forward(x, weight, bias, gamma, beta)
    out = jax.block_until_ready(out)

    ref = reference_forward(x, weight, bias, gamma, beta)
    assert out.shape == (N, Cout, 2 * D, 2 * H, 2 * W)
    assert bool(jnp.allclose(out, ref, atol=1e-4, rtol=1e-4)), "mismatch vs reference"

    print("KERNEL_OK")
</pallas_src>

<mosaic_0001>
module attributes {stable_mosaic.version = 11 : i64} {
  func.func @deconv_stats_kernel(%arg0: i32, %arg1: memref<128x4xf32, #tpu.memory_space<vmem>>, %arg2: memref<4x128xf32, #tpu.memory_space<vmem>>, %arg3: memref<1x1x128xf32, #tpu.memory_space<vmem>>, %arg4: memref<1x1x128xf32, #tpu.memory_space<vmem>>) attributes {dimension_semantics = [#tpu.dimension_semantics<parallel>], iteration_bounds = array<i64: 1>, scalar_prefetch = 0 : i64, scratch_operands = 0 : i64, tpu.core_type = #tpu.core_type<tc>, window_params = [{transform_indices = @transform_0, window_bounds = array<i64: 128, 4>}, {pipeline_mode = #tpu.pipeline_mode<synchronous>, transform_indices = @transform_1, window_bounds = array<i64: 4, 128>}, {transform_indices = @transform_2, window_bounds = array<i64: 1, 1, 128>}, {transform_indices = @transform_3, window_bounds = array<i64: 1, 1, 128>}]} {
    %c0 = arith.constant 0 : index
    %c0_0 = arith.constant 0 : index
    %0 = vector.load %arg1[%c0, %c0_0] : memref<128x4xf32, #tpu.memory_space<vmem>>, vector<128x4xf32>
    %c0_1 = arith.constant 0 : index
    %c0_2 = arith.constant 0 : index
    %1 = vector.load %arg2[%c0_1, %c0_2] : memref<4x128xf32, #tpu.memory_space<vmem>>, vector<4x128xf32>
    %cst = arith.constant dense<0.000000e+00> : vector<128x128xf32>
    %2 = tpu.matmul %0, %1, %cst {dimension_numbers = #tpu.dot_dimension_numbers<[1], [0], [0], [1], [0, 0, 1, 1], [], []>} : vector<128x4xf32>, vector<4x128xf32>, vector<128x128xf32> -> vector<128x128xf32>
    %cst_3 = arith.constant dense<0.000000e+00> : vector<128xf32>
    %3 = vector.multi_reduction <add>, %2, %cst_3 [0] : vector<128x128xf32> to vector<128xf32>
    %4 = vector.shape_cast %3 : vector<128xf32> to vector<1x1x128xf32>
    %c0_4 = arith.constant 0 : index
    %c0_5 = arith.constant 0 : index
    %c0_6 = arith.constant 0 : index
    %5 = vector.load %arg3[%c0_4, %c0_5, %c0_6] : memref<1x1x128xf32, #tpu.memory_space<vmem>>, vector<1x1x128xf32>
    tpu.vector_store %arg3[%c0_4, %c0_5, %c0_6], %4 {strides = array<i32>} : memref<1x1x128xf32, #tpu.memory_space<vmem>>, vector<1x1x128xf32>,
    %6 = arith.mulf %2, %2 : vector<128x128xf32>
    %cst_7 = arith.constant dense<0.000000e+00> : vector<128xf32>
    %7 = vector.multi_reduction <add>, %6, %cst_7 [0] : vector<128x128xf32> to vector<128xf32>
    %8 = vector.shape_cast %7 : vector<128xf32> to vector<1x1x128xf32>
    %c0_8 = arith.constant 0 : index
    %c0_9 = arith.constant 0 : index
    %c0_10 = arith.constant 0 : index
    %9 = vector.load %arg4[%c0_8, %c0_9, %c0_10] : memref<1x1x128xf32, #tpu.memory_space<vmem>>, vector<1x1x128xf32>
    tpu.vector_store %arg4[%c0_8, %c0_9, %c0_10], %8 {strides = array<i32>} : memref<1x1x128xf32, #tpu.memory_space<vmem>>, vector<1x1x128xf32>,
    return
  }
  func.func @transform_0(%arg0: i32) -> (i32, i32) {
    %c0_i32 = arith.constant 0 : i32
    %c0_i32_0 = arith.constant 0 : i32
    return %arg0, %c0_i32 : i32, i32
  }
  func.func @transform_1(%arg0: i32) -> (i32, i32) {
    %c0_i32 = arith.constant 0 : i32
    %c0_i32_0 = arith.constant 0 : i32
    %c0_i32_1 = arith.constant 0 : i32
    return %c0_i32, %c0_i32_0 : i32, i32
  }
  func.func @transform_2(%arg0: i32) -> (i32, i32, i32) {
    %c0_i32 = arith.constant 0 : i32
    %c0_i32_0 = arith.constant 0 : i32
    %c0_i32_1 = arith.constant 0 : i32
    return %arg0, %c0_i32, %c0_i32_0 : i32, i32, i32
  }
  func.func @transform_3(%arg0: i32) -> (i32, i32, i32) {
    %c0_i32 = arith.constant 0 : i32
    %c0_i32_0 = arith.constant 0 : i32
    %c0_i32_1 = arith.constant 0 : i32
    return %arg0, %c0_i32, %c0_i32_0 : i32, i32, i32
  }
}

</mosaic_0001>

<bundles_post_ra>
// kernel: tpu_custom_call.1
= control target key start
LH: loop header
LB: loop body
LE: loop exit
PB: predicated region body
PF: predicated region fallthrough
CT: control target
= control target key end

     0   :  { %9 = vsyncpa [#allocation3], 0  ;;  %vm81_vm0 = vcmask 1043456   ;;  %vm32_vm1 = vcmask 31744   ;;  %s521_s0 = inlined_call_operand.vmem [shape: f32[128,4], index: 0, kind: input, shape index: {}]   ;;  %s522_s1 = inlined_call_operand.vmem [shape: f32[4,128], index: 1, kind: input, shape index: {}]   ;;  %s523_s2 = inlined_call_operand.hbm [shape: f32[1,1,128], index: 2, kind: output, shape index: {0}]   ;;  %s524_s3 = inlined_call_operand.hbm [shape: f32[1,1,128], index: 3, kind: output, shape index: {1}]  }
   0x1   :  { %v31_v0 = vld [vmem:[%s522_s1] sm:$0xf]  ;;  %v16_v2 = vld [vmem:[%s521_s0 + $0x8] sm:$0xff]  ;;  %v17_v3 = vld [vmem:[%s521_s0 + $0x10] sm:$0xff] }
   0x2   :  { %v15_v1 = vld [vmem:[%s521_s0] sm:$0xff]  ;;  %352 = vmatprep.subr.msk.mxu0 %vm81_vm0, %v31_v0  ;;  %378 = vmatprep.subr.msk.mxu1 %vm81_vm0, %v31_v0  ;;  %v24_v5 = vld [vmem:[%s521_s0 + $0x48] sm:$0xff]  ;;  %v25_v6 = vld [vmem:[%s521_s0 + $0x50] sm:$0xff] }
   0x3   :  { %354 = vmatprep.mubr.msk.f32.mxu0 %vm32_vm1, %v15_v1  ;;  %353 = vmatpush3.msk.msra.mxu0 %vm81_vm0, %v31_v0  ;;  %v23_v4 = vld [vmem:[%s521_s0 + $0x40] sm:$0xff]  ;;  %v18_v7 = vld [vmem:[%s521_s0 + $0x18] sm:$0xff] }
   0x4   :  { %355 = vmatmul.mubr.msk.f32.vlgmr.msra.gmra.mxu0 %vm32_vm1, %v16_v2  ;;  %379 = vmatpush3.msk.msra.mxu1 %vm81_vm0, %v31_v0  ;;  %v19_v8 = vld [vmem:[%s521_s0 + $0x20] sm:$0xff] }
   0x5   :  { %357 = vmatprep.mubr.msk.f32.mxu0 %vm32_vm1, %v17_v3  ;;  %366 = vmatprep.mubr.msk.f32.mxu1 %vm32_vm1, %v23_v4 }
   0x6   :  { %367 = vmatmul.mubr.msk.f32.vlgmr.msra.gmra.mxu1 %vm32_vm1, %v24_v5 }
   0x7   :  { %10 = vsyncpa [#allocation5], 0  ;;  %369 = vmatprep.mubr.msk.f32.mxu1 %vm32_vm1, %v25_v6  ;;  %v26_v9 = vld [vmem:[%s521_s0 + $0x58] sm:$0xff]  ;;  %v27_v10 = vld [vmem:[%s521_s0 + $0x60] sm:$0xff]  ;;  %s427_s19 = smov [#allocation4]  }
   0x8   :  { %358 = vmatmul.mubr.msk.f32.gmra.mxu0 %vm32_vm1, %v18_v7  ;;  %v20_v11 = vld [vmem:[%s521_s0 + $0x28] sm:$0xff]  ;;  %v21_v12 = vld [vmem:[%s521_s0 + $0x30] sm:$0xff]  ;;  %v22_v15 = vld [vmem:[%s521_s0 + $0x38] sm:$0xff]  ;;  %s306_s1 = sshll.u32 %s427_s19, 4  ;;  %s307_s1 = int_to_ptr.vmem [resolvable:$true] %s306_s1 }
   0x9   :  { %360 = vmatprep.mubr.msk.f32.mxu0 %vm32_vm1, %v19_v8  ;;  %v28_v13 = vld [vmem:[%s521_s0 + $0x68] sm:$0xff]  ;;  %v29_v14 = vld [vmem:[%s521_s0 + $0x70] sm:$0xff]  ;;  %v30_v16 = vld [vmem:[%s521_s0 + $0x78] sm:$0xff]  ;;  %s426_s0 = smov [#allocation2]  }
   0xa   :  { %370 = vmatmul.mubr.msk.f32.gmra.mxu1 %vm32_vm1, %v26_v9  ;;  %s296_s18 = sshll.u32 %s426_s0, 4  ;;  %s297_s18 = int_to_ptr.vmem [resolvable:$true] %s296_s18 }
   0xb   :  { %372 = vmatprep.mubr.msk.f32.mxu1 %vm32_vm1, %v27_v10  ;;  %s382_s20 = scalar_lea.vmem %s297_s18, 16  ;;  %s386_s21 = scalar_lea.vmem %s297_s18, 32 }
   0xc   :  { %361 = vmatmul.mubr.msk.f32.gmra.mxu0 %vm32_vm1, %v20_v11  ;;  %p383_p0 = scmp.ne.s32.totalorder %s297_s18, %s382_s20  ;;  %p387_p1 = scmp.lt.s32.totalorder %s297_s18, %s297_s18 }
   0xd   :  { %363 = vmatprep.mubr.msk.f32.mxu0 %vm32_vm1, %v21_v12  ;;  %p388_p2 = scmp.lt.s32.totalorder %s386_s21, %s382_s20 }
   0xe   :  { %373 = vmatmul.mubr.msk.f32.gmra.mxu1 %vm32_vm1, %v28_v13 }
   0xf   :  { %375 = vmatprep.mubr.msk.f32.mxu1 %vm32_vm1, %v29_v14  ;;  %p389_p3 = por %p388_p2, %p387_p1 }
  0x10   :  { %364 = vmatmul.mubr.msk.f32.gmra.mxu0 %vm32_vm1, %v22_v15 }
  0x11   :  { %p390_p4 = pnand %p389_p3, %p383_p0 }
  0x12   :  { %376 = vmatmul.mubr.msk.f32.gmra.mxu1 %vm32_vm1, %v30_v16 }
  0xc4   :  { %v356_v17 = vpop.f32.mrf.mxu0 }
  0xc5   :  { %v253_v23 = vmul.f32 %v356_v17, %v356_v17 }
  0xc6   :  { %v151_v18 = vpop.f32.mrf.mxu0  ;;  %v368_v19 = vpop.f32.mrf.mxu1 }
  0xc7   :  { %v252_v20 = vmul.f32 %v151_v18, %v151_v18  ;;  %v230_v24 = vadd.f32 %v356_v17, %v151_v18  ;;  %v261_v55 = vmul.f32 %v368_v19, %v368_v19 }
  0xc8   :  { %v359_v21 = vpop.f32.mrf.mxu0  ;;  %v191_v22 = vpop.f32.mrf.mxu1 }
  0xc9   :  { %v268_v26 = vadd.f32 %v253_v23, %v252_v20  ;;  %v255_v31 = vmul.f32 %v359_v21, %v359_v21  ;;  %v260_v53 = vmul.f32 %v191_v22, %v191_v22 }
  0xca   :  { %v161_v25 = vpop.f32.mrf.mxu0  ;;  %v371_v30 = vpop.f32.mrf.mxu1 }
  0xcb   :  { %v231_v27 = vadd.f32 %v230_v24, %v161_v25  ;;  %v254_v28 = vmul.f32 %v161_v25, %v161_v25  ;;  %v263_v62 = vmul.f32 %v371_v30, %v371_v30 }
  0xcc   :  { %v362_v29 = vpop.f32.mrf.mxu0  ;;  %v201_v39 = vpop.f32.mrf.mxu1 }
  0xcd   :  { %v269_v32 = vadd.f32 %v268_v26, %v254_v28  ;;  %v232_v33 = vadd.f32 %v359_v21, %v231_v27  ;;  %v257_v40 = vmul.f32 %v362_v29, %v362_v29  ;;  %v262_v59 = vmul.f32 %v201_v39, %v201_v39 }
  0xce   :  { %v171_v34 = vpop.f32.mrf.mxu0  ;;  %v374_v47 = vpop.f32.mrf.mxu1 }
  0xcf   :  { %v233_v35 = vadd.f32 %v232_v33, %v171_v34  ;;  %v256_v36 = vmul.f32 %v171_v34, %v171_v34  ;;  %v270_v37 = vadd.f32 %v269_v32, %v255_v31  ;;  %v265_v5 = vmul.f32 %v374_v47, %v374_v47 }
  0xd0   :  { %v365_v38 = vpop.f32.mrf.mxu0  ;;  %v211_v54 = vpop.f32.mrf.mxu1 }
  0xd1   :  { %v271_v41 = vadd.f32 %v270_v37, %v256_v36  ;;  %v234_v42 = vadd.f32 %v362_v29, %v233_v35  ;;  %v259_v48 = vmul.f32 %v365_v38, %v365_v38  ;;  %v264_v2 = vmul.f32 %v211_v54, %v211_v54 }
  0xd2   :  { %v181_v43 = vpop.f32.mrf.mxu0  ;;  %v377_v61 = vpop.f32.mrf.mxu1 }
  0xd3   :  { %v235_v44 = vadd.f32 %v234_v42, %v181_v43  ;;  %v258_v45 = vmul.f32 %v181_v43, %v181_v43  ;;  %v272_v46 = vadd.f32 %v271_v41, %v257_v40  ;;  %v267_v11 = vmul.f32 %v377_v61, %v377_v61 }
  0xd4   :  { %v221_v4 = vpop.f32.mrf.mxu1 }
  0xd5   :  { %v236_v49 = vadd.f32 %v365_v38, %v235_v44  ;;  %v273_v50 = vadd.f32 %v272_v46, %v258_v45  ;;  %v266_v9 = vmul.f32 %v221_v4, %v221_v4 }
  0xd7   :  { %v274_v51 = vadd.f32 %v273_v50, %v259_v48  ;;  %v237_v52 = vadd.f32 %v236_v49, %v191_v22 }
  0xd9   :  { %v275_v56 = vadd.f32 %v274_v51, %v260_v53  ;;  %v238_v57 = vadd.f32 %v368_v19, %v237_v52 }
  0xdb   :  { %v239_v58 = vadd.f32 %v238_v57, %v201_v39  ;;  %v276_v60 = vadd.f32 %v275_v56, %v261_v55 }
  0xdd   :  { %v277_v63 = vadd.f32 %v276_v60, %v262_v59  ;;  %v240_v0 = vadd.f32 %v371_v30, %v239_v58 }
  0xdf   :  { %v241_v1 = vadd.f32 %v240_v0, %v211_v54  ;;  %v278_v3 = vadd.f32 %v277_v63, %v263_v62 }
  0xe1   :  { %v279_v6 = vadd.f32 %v278_v3, %v264_v2  ;;  %v242_v7 = vadd.f32 %v374_v47, %v241_v1 }
  0xe3   :  { %v243_v8 = vadd.f32 %v242_v7, %v221_v4  ;;  %v280_v10 = vadd.f32 %v279_v6, %v265_v5 }
  0xe5   :  { %v244_v12 = vadd.f32 %v377_v61, %v243_v8  ;;  %v281_v13 = vadd.f32 %v280_v10, %v266_v9 }
  0xe7   :  { %v245_v14 = vrot.slane %v244_v12, 4  ;;  %v282_v15 = vadd.f32 %v281_v13, %v267_v11 }
  0xe9   :  { %v246_v16 = vadd.f32 %v245_v14, %v244_v12  ;;  %v283_v17 = vrot.slane %v282_v15, 4 }
  0xeb   :  { %v247_v18 = vrot.slane %v246_v16, 2  ;;  %v284_v19 = vadd.f32 %v283_v17, %v282_v15 }
  0xed   :  { %v248_v20 = vadd.f32 %v247_v18, %v246_v16  ;;  %v285_v21 = vrot.slane %v284_v19, 2 }
  0xef   :  { %v249_v22 = vrot.slane %v248_v20, 1  ;;  %v286_v23 = vadd.f32 %v285_v21, %v284_v19 }
  0xf1   :  { %v250_v24 = vadd.f32 %v249_v22, %v248_v20  ;;  %v287_v25 = vrot.slane %v286_v23, 1 }
  0xf3   :  { %251 = vst [vmem:[#allocation2] sm:$0x1] %v250_v24  ;;  %v288_v26 = vadd.f32 %v287_v25, %v286_v23 }
  0xf4   :  { %393 = shalt.err (!%p390_p4)
}
  0xf5   :  { %299 = dma.vmem_to_hbm [thread:$0]  %s297_s18, 16, %s523_s2, [#allocation3]   ;;  %289 = vst [vmem:[#allocation4] sm:$0x1] %v288_v26 }
  0xf6   :  { %s402_s24 = scalar_lea.vmem %s307_s1, 16  ;;  %s406_s25 = scalar_lea.vmem %s307_s1, 32 }
  0xf7   :  { %p403_p5 = scmp.ne.s32.totalorder %s307_s1, %s402_s24  ;;  %p407_p6 = scmp.lt.s32.totalorder %s307_s1, %s307_s1 }
  0xf8   :  { %p408_p7 = scmp.lt.s32.totalorder %s406_s25, %s402_s24 }
  0xfa   :  { %p409_p8 = por %p408_p7, %p407_p6 }
  0xfc   :  { %p410_p9 = pnand %p409_p8, %p403_p5 }
  0xfe   :  { %413 = shalt.err (!%p410_p9)
}
  0xff   :  { %309 = dma.vmem_to_hbm [thread:$0]  %s307_s1, 16, %s524_s3, [#allocation5]  }
 0x100   :  { %422 = dma.done.wait [#allocation3], 16  }
 0x101   :  { %423 = vsyncadd [#allocation3], 4294967280 }
 0x102   :  { %424 = dma.done.wait [#allocation5], 16  }
 0x103   :  { %425 = vsyncadd [#allocation5], 4294967280 }
 0x104   :  { %316 = vsyncpa [#allocation3], 1 }
 0x105   :  { %317 = vsyncpa [#allocation5], 1 }

</bundles_post_ra>
